<compile_context>
chip_gen: v6e
topology: v6e:2x2x1
jax: 0.10.0
libtpu: 0.0.40
codegen_flags: <defaults>
</compile_context>

<pallas_src>
import functools

import jax
import jax.numpy as jnp
from jax.experimental import pallas as pl
from jax.experimental.pallas import tpu as pltpu


# --------------------------------------------------------------------------
# Lane-reversal helpers (horizontal flip along W)
# --------------------------------------------------------------------------
def _lane_reverse_native(x):
    """Reverse the last (lane) axis with lax.rev — pure data movement (XLU)."""
    return jax.lax.rev(x, (x.ndim - 1,))


def _lane_reverse_matmul(x):
    """Fallback: reversal as a matmul against an in-kernel permutation matrix
    (exact for f32 0/1 entries).  Only used if Mosaic rejects lax.rev."""
    W = x.shape[-1]
    r = jax.lax.broadcasted_iota(jnp.int32, (W, W), 0)
    c = jax.lax.broadcasted_iota(jnp.int32, (W, W), 1)
    P = (r + c == W - 1).astype(jnp.float32)
    x2 = x.reshape(-1, W)
    y = jnp.dot(x2, P, preferred_element_type=jnp.float32)
    return y.astype(x.dtype).reshape(x.shape)


@functools.lru_cache(maxsize=None)
def _lane_reverse_supported(shape) -> bool:
    """Trace-time probe: does this Mosaic build lower lax.rev on the lane dim?"""
    def _probe_kernel(x_ref, o_ref):
        o_ref[...] = jax.lax.rev(x_ref[...], (len(shape) - 1,))

    try:
        fn = pl.pallas_call(
            _probe_kernel,
            out_shape=jax.ShapeDtypeStruct(shape, jnp.float32))
        jax.jit(fn).lower(jnp.zeros(shape, jnp.float32)).compile()
        return True
    except Exception:
        return False


# --------------------------------------------------------------------------
# Kernel
# --------------------------------------------------------------------------
def _augment_kernel(rev_fn, params_ref, img_ref, depth_ref,
                    img_out_ref, depth_out_ref):
    b = pl.program_id(0)
    base = 5 * b
    flip_flag = params_ref[base + 0]   # 0.0 / 1.0
    gamma     = params_ref[base + 1]   # scalar gamma
    r_gain    = params_ref[base + 2]   # planckian red gain
    b_gain    = params_ref[base + 3]   # planckian blue gain
    jit_flag  = params_ref[base + 4]   # 0.0 / 1.0

    do_flip = flip_flag > 0.5

    # ---------------- horizontal flip (image + depth, shared params) --------
    x = img_ref[0]                                  # (C, TH, W)
    x = jnp.where(do_flip, rev_fn(x), x)

    d = depth_ref[0]                                # (1, TH, W)
    d = jnp.where(do_flip, rev_fn(d), d)
    depth_out_ref[0] = d.astype(depth_out_ref.dtype)

    # ---------------- random gamma:  x ** gamma  (x in [0, 1]) --------------
    safe = jnp.maximum(x, 1e-12)
    x = jnp.where(x > 0.0, jnp.exp(gamma * jnp.log(safe)), 0.0)

    # ---------------- planckian jitter: per-channel scalar gains, clamp -----
    # jitter flag folded into the scalars; with inputs in [0, 1] the clamp is
    # a no-op on unjittered / green channels, matching kornia semantics.
    one = jnp.float32(1.0)
    r_eff = jnp.where(jit_flag > 0.5, r_gain, one)
    b_eff = jnp.where(jit_flag > 0.5, b_gain, one)

    C = img_ref.shape[1]
    for c in range(C):                              # static unroll (C == 3)
        xc = x[c]
        if c == 0:
            xc = xc * r_eff
        elif c == 2:
            xc = xc * b_eff
        img_out_ref[0, c] = jnp.minimum(xc, 1.0).astype(img_out_ref.dtype)


# --------------------------------------------------------------------------
# Parameter sampling (plain-JAX glue, deterministic)
# --------------------------------------------------------------------------
# Small synthetic blackbody coefficient table (r, g, b); stand-in for kornia's
# planckian LUT.
_PLANCKIAN_TABLE = jnp.array(
    [[1.5289, 1.0, 0.3670],
     [1.3244, 1.0, 0.5370],
     [1.1847, 1.0, 0.6929],
     [1.0825, 1.0, 0.8321],
     [1.0000, 1.0, 1.0000],
     [0.9222, 1.0, 1.1586]], dtype=jnp.float32)


def make_aug_params(key, batch):
    """Per-sample augmentation parameters, shape (B, 5) f32:
       [flip_flag, gamma, r_gain, b_gain, jitter_flag]."""
    k1, k2, k3, k4 = jax.random.split(key, 4)
    flip_flag = jax.random.bernoulli(k1, 0.5, (batch,)).astype(jnp.float32)
    gamma = (jax.random.uniform(k2, (batch,)) - 0.5) * 0.2 + 1.0
    idx = jax.random.randint(k3, (batch,), 0, _PLANCKIAN_TABLE.shape[0])
    r_gain = _PLANCKIAN_TABLE[idx, 0] / _PLANCKIAN_TABLE[idx, 1]
    b_gain = _PLANCKIAN_TABLE[idx, 2] / _PLANCKIAN_TABLE[idx, 1]
    jit_flag = jax.random.bernoulli(k4, 0.5, (batch,)).astype(jnp.float32)
    return jnp.stack([flip_flag, gamma, r_gain, b_gain, jit_flag], axis=1)


# --------------------------------------------------------------------------
# Wrapper
# --------------------------------------------------------------------------
def _pick_th(C, H, W, budget_bytes=2 << 20):
    """Largest H tile (multiple of 8, dividing H) keeping one image block
    within ~budget_bytes; whole H if the full image already fits."""
    if C * H * W * 4 <= budget_bytes:
        return H
    best = None
    for th in range(8, H, 8):
        if H % th == 0 and C * th * W * 4 <= budget_bytes:
            best = th
    return best if best is not None else H


def data_augmentation(image, depth, params):
    """image: (B, C, H, W) f32 in [0, 1]; depth: (B, 1, H, W) f32;
       params: (B, 5) f32 from make_aug_params."""
    B, C, H, W = image.shape
    assert depth.shape == (B, 1, H, W)
    assert params.shape == (B, 5)
    assert C == 3, "planckian jitter expects RGB images"

    TH = _pick_th(C, H, W)
    n_h = H // TH

    rev_fn = (_lane_reverse_native
              if _lane_reverse_supported((C, TH, W))
              else _lane_reverse_matmul)

    # VMEM budget: (image + depth) tiles, in + out, double-buffered, + headroom.
    img_tile = C * TH * W * 4
    dep_tile = TH * W * 4
    needed = 2 * 2 * (img_tile + dep_tile)
    vmem_limit = int(max(16 << 20, min(56 << 20, needed + (4 << 20))))

    kernel = functools.partial(_augment_kernel, rev_fn)
    out_img, out_depth = pl.pallas_call(
        kernel,
        out_shape=(jax.ShapeDtypeStruct((B, C, H, W), jnp.float32),
                   jax.ShapeDtypeStruct((B, 1, H, W), jnp.float32)),
        grid=(B, n_h),
        in_specs=[
            pl.BlockSpec(memory_space=pltpu.MemorySpace.SMEM),        # params (1-D)
            pl.BlockSpec((1, C, TH, W), lambda b, h: (b, 0, h, 0)),   # image
            pl.BlockSpec((1, 1, TH, W), lambda b, h: (b, 0, h, 0)),   # depth
        ],
        out_specs=(
            pl.BlockSpec((1, C, TH, W), lambda b, h: (b, 0, h, 0)),
            pl.BlockSpec((1, 1, TH, W), lambda b, h: (b, 0, h, 0)),
        ),
        compiler_params=pltpu.CompilerParams(
            dimension_semantics=("parallel", "parallel"),
            vmem_limit_bytes=vmem_limit),
    )(params.reshape(-1).astype(jnp.float32), image, depth)
    return out_img, out_depth


# --------------------------------------------------------------------------
# Plain-JAX reference (verification)
# --------------------------------------------------------------------------
def _reference(image, depth, params):
    flip = (params[:, 0] > 0.5)[:, None, None, None]
    gamma = params[:, 1][:, None, None, None]
    r = params[:, 2][:, None, None, None]
    bl = params[:, 3][:, None, None, None]
    jit = (params[:, 4] > 0.5)[:, None, None, None]

    img = jnp.where(flip, image[..., ::-1], image)
    dep = jnp.where(flip, depth[..., ::-1], depth)

    img = jnp.where(img > 0.0,
                    jnp.exp(gamma * jnp.log(jnp.maximum(img, 1e-12))), 0.0)

    C = image.shape[1]
    ch = jnp.arange(C)[None, :, None, None]
    gain = jnp.where(ch == 0, r, jnp.where(ch == 2, bl, 1.0))
    img = jnp.where(jit, jnp.minimum(img * gain, 1.0), img)
    return img, dep


if __name__ == "__main__":
    key = jax.random.PRNGKey(0)
    k_img, k_dep, k_aug = jax.random.split(key, 3)

    B, C, H, W = 2, 3, 16, 16
    image = jax.random.uniform(k_img, (B, C, H, W), dtype=jnp.float32)  # [0, 1]
    depth = jax.random.uniform(k_dep, (B, 1, H, W), dtype=jnp.float32)

    params = make_aug_params(k_aug, B)
    # force both code paths (flip / no-flip, jitter / no-jitter) to be exercised
    params = params.at[0, 0].set(1.0).at[0, 4].set(1.0)
    params = params.at[1, 0].set(0.0).at[1, 4].set(0.0)

    out_img, out_depth = data_augmentation(image, depth, params)
    jax.block_until_ready((out_img, out_depth))

    ref_img, ref_depth = _reference(image, depth, params)
    assert jnp.allclose(out_img, ref_img, atol=1e-5, rtol=1e-5)
    assert jnp.allclose(out_depth, ref_depth, atol=1e-5, rtol=1e-5)

    print("KERNEL_OK")
</pallas_src>

<mosaic_0001>
module attributes {stable_mosaic.version = 11 : i64} {
  func.func @_augment_kernel(%arg0: i32, %arg1: i32, %arg2: memref<10xf32, #tpu.memory_space<smem>>, %arg3: memref<1x3x16x16xf32, #tpu.memory_space<vmem>>, %arg4: memref<1x1x16x16xf32, #tpu.memory_space<vmem>>, %arg5: memref<1x3x16x16xf32, #tpu.memory_space<vmem>>, %arg6: memref<1x1x16x16xf32, #tpu.memory_space<vmem>>) attributes {dimension_semantics = [#tpu.dimension_semantics<parallel>, #tpu.dimension_semantics<parallel>], iteration_bounds = array<i64: 2, 1>, scalar_prefetch = 0 : i64, scratch_operands = 0 : i64, tpu.core_type = #tpu.core_type<tc>, window_params = [{transform_indices = @transform_0, window_bounds = array<i64: 10>}, {transform_indices = @transform_1, window_bounds = array<i64: 1, 3, 16, 16>}, {transform_indices = @transform_2, window_bounds = array<i64: 1, 1, 16, 16>}, {transform_indices = @transform_3, window_bounds = array<i64: 1, 3, 16, 16>}, {transform_indices = @transform_4, window_bounds = array<i64: 1, 1, 16, 16>}]} {
    %c5_i32 = arith.constant 5 : i32
    %0 = arith.muli %c5_i32, %arg0 : i32
    %c0_i32 = arith.constant 0 : i32
    %1 = arith.addi %0, %c0_i32 : i32
    %2 = arith.index_cast %1 : i32 to index
    %3 = memref.load %arg2[%2] : memref<10xf32, #tpu.memory_space<smem>>
    %c1_i32 = arith.constant 1 : i32
    %4 = arith.addi %0, %c1_i32 : i32
    %5 = arith.index_cast %4 : i32 to index
    %6 = memref.load %arg2[%5] : memref<10xf32, #tpu.memory_space<smem>>
    %c2_i32 = arith.constant 2 : i32
    %7 = arith.addi %0, %c2_i32 : i32
    %8 = arith.index_cast %7 : i32 to index
    %9 = memref.load %arg2[%8] : memref<10xf32, #tpu.memory_space<smem>>
    %c3_i32 = arith.constant 3 : i32
    %10 = arith.addi %0, %c3_i32 : i32
    %11 = arith.index_cast %10 : i32 to index
    %12 = memref.load %arg2[%11] : memref<10xf32, #tpu.memory_space<smem>>
    %c4_i32 = arith.constant 4 : i32
    %13 = arith.addi %0, %c4_i32 : i32
    %14 = arith.index_cast %13 : i32 to index
    %15 = memref.load %arg2[%14] : memref<10xf32, #tpu.memory_space<smem>>
    %cst = arith.constant 5.000000e-01 : f32
    %16 = arith.cmpf ogt, %3, %cst : f32
    %c0 = arith.constant 0 : index
    %c0_0 = arith.constant 0 : index
    %c0_1 = arith.constant 0 : index
    %c0_2 = arith.constant 0 : index
    %17 = vector.load %arg3[%c0, %c0_0, %c0_1, %c0_2] : memref<1x3x16x16xf32, #tpu.memory_space<vmem>>, vector<1x3x16x16xf32>
    %18 = vector.shape_cast %17 : vector<1x3x16x16xf32> to vector<3x16x16xf32>
    %19 = tpu.iota {dimensions = array<i32: 0>} : vector<16x16xi32>
    %20 = tpu.iota {dimensions = array<i32: 1>} : vector<16x16xi32>
    %21 = arith.addi %19, %20 : vector<16x16xi32>
    %c15_i32 = arith.constant 15 : i32
    %22 = vector.broadcast %c15_i32 : i32 to vector<16x16xi32>
    %23 = arith.cmpi eq, %21, %22 : vector<16x16xi32>
    %24 = arith.extui %23 : vector<16x16xi1> to vector<16x16xi32>
    %25 = arith.sitofp %24 : vector<16x16xi32> to vector<16x16xf32>
    %26 = vector.shape_cast %18 : vector<3x16x16xf32> to vector<48x16xf32>
    %cst_3 = arith.constant dense<0.000000e+00> : vector<48x16xf32>
    %27 = tpu.matmul %26, %25, %cst_3 {dimension_numbers = #tpu.dot_dimension_numbers<[1], [0], [0], [1], [0, 0, 1, 1], [], []>} : vector<48x16xf32>, vector<16x16xf32>, vector<48x16xf32> -> vector<48x16xf32>
    %28 = vector.shape_cast %27 : vector<48x16xf32> to vector<3x16x16xf32>
    %29 = arith.select %16, %28, %18 : vector<3x16x16xf32>
    %c0_4 = arith.constant 0 : index
    %c0_5 = arith.constant 0 : index
    %c0_6 = arith.constant 0 : index
    %c0_7 = arith.constant 0 : index
    %30 = vector.load %arg4[%c0_4, %c0_5, %c0_6, %c0_7] : memref<1x1x16x16xf32, #tpu.memory_space<vmem>>, vector<1x1x16x16xf32>
    %31 = vector.shape_cast %30 : vector<1x1x16x16xf32> to vector<1x16x16xf32>
    %32 = tpu.iota {dimensions = array<i32: 0>} : vector<16x16xi32>
    %33 = tpu.iota {dimensions = array<i32: 1>} : vector<16x16xi32>
    %34 = arith.addi %32, %33 : vector<16x16xi32>
    %c15_i32_8 = arith.constant 15 : i32
    %35 = vector.broadcast %c15_i32_8 : i32 to vector<16x16xi32>
    %36 = arith.cmpi eq, %34, %35 : vector<16x16xi32>
    %37 = arith.extui %36 : vector<16x16xi1> to vector<16x16xi32>
    %38 = arith.sitofp %37 : vector<16x16xi32> to vector<16x16xf32>
    %39 = vector.shape_cast %31 : vector<1x16x16xf32> to vector<16x16xf32>
    %cst_9 = arith.constant dense<0.000000e+00> : vector<16x16xf32>
    %40 = tpu.matmul %39, %38, %cst_9 {dimension_numbers = #tpu.dot_dimension_numbers<[1], [0], [0], [1], [0, 0, 1, 1], [], []>} : vector<16x16xf32>, vector<16x16xf32>, vector<16x16xf32> -> vector<16x16xf32>
    %41 = vector.shape_cast %40 : vector<16x16xf32> to vector<1x16x16xf32>
    %42 = arith.select %16, %41, %31 : vector<1x16x16xf32>
    %c0_10 = arith.constant 0 : index
    %c0_11 = arith.constant 0 : index
    %c0_12 = arith.constant 0 : index
    %c0_13 = arith.constant 0 : index
    %43 = vector.load %arg6[%c0_10, %c0_11, %c0_12, %c0_13] : memref<1x1x16x16xf32, #tpu.memory_space<vmem>>, vector<1x1x16x16xf32>
    %44 = vector.shape_cast %43 : vector<1x1x16x16xf32> to vector<1x16x16xf32>
    %45 = vector.shape_cast %42 : vector<1x16x16xf32> to vector<1x1x16x16xf32>
    tpu.vector_store %arg6[%c0_10, %c0_11, %c0_12, %c0_13], %45 {strides = array<i32>} : memref<1x1x16x16xf32, #tpu.memory_space<vmem>>, vector<1x1x16x16xf32>,
    %cst_14 = arith.constant 9.99999996E-13 : f32
    %46 = vector.broadcast %cst_14 : f32 to vector<3x16x16xf32>
    %47 = arith.maximumf %29, %46 : vector<3x16x16xf32>
    %cst_15 = arith.constant 0.000000e+00 : f32
    %48 = vector.broadcast %cst_15 : f32 to vector<3x16x16xf32>
    %49 = arith.cmpf ogt, %29, %48 : vector<3x16x16xf32>
    %50 = math.log %47 : vector<3x16x16xf32>
    %51 = vector.broadcast %6 : f32 to vector<3x16x16xf32>
    %52 = arith.mulf %51, %50 : vector<3x16x16xf32>
    %53 = math.exp %52 : vector<3x16x16xf32>
    %cst_16 = arith.constant 0.000000e+00 : f32
    %54 = vector.broadcast %cst_16 : f32 to vector<3x16x16xf32>
    %55 = arith.select %49, %53, %54 : vector<3x16x16xi1>, vector<3x16x16xf32>
    %cst_17 = arith.constant 5.000000e-01 : f32
    %56 = arith.cmpf ogt, %15, %cst_17 : f32
    %cst_18 = arith.constant 1.000000e+00 : f32
    %57 = arith.select %56, %9, %cst_18 : f32
    %cst_19 = arith.constant 5.000000e-01 : f32
    %58 = arith.cmpf ogt, %15, %cst_19 : f32
    %cst_20 = arith.constant 1.000000e+00 : f32
    %59 = arith.select %58, %12, %cst_20 : f32
    %60 = vector.extract_strided_slice %55 {offsets = [0, 0, 0], sizes = [1, 16, 16], strides = [1, 1, 1]} : vector<3x16x16xf32> to vector<1x16x16xf32>
    %61 = vector.shape_cast %60 : vector<1x16x16xf32> to vector<16x16xf32>
    %62 = vector.broadcast %57 : f32 to vector<16x16xf32>
    %63 = arith.mulf %61, %62 : vector<16x16xf32>
    %cst_21 = arith.constant 1.000000e+00 : f32
    %64 = vector.broadcast %cst_21 : f32 to vector<16x16xf32>
    %65 = arith.minimumf %63, %64 : vector<16x16xf32>
    %c0_22 = arith.constant 0 : index
    %c0_23 = arith.constant 0 : index
    %c0_24 = arith.constant 0 : index
    %c0_25 = arith.constant 0 : index
    %66 = vector.load %arg5[%c0_22, %c0_23, %c0_24, %c0_25] : memref<1x3x16x16xf32, #tpu.memory_space<vmem>>, vector<1x1x16x16xf32>
    %67 = vector.shape_cast %66 : vector<1x1x16x16xf32> to vector<16x16xf32>
    %68 = vector.shape_cast %65 : vector<16x16xf32> to vector<1x1x16x16xf32>
    tpu.vector_store %arg5[%c0_22, %c0_23, %c0_24, %c0_25], %68 {strides = array<i32>} : memref<1x3x16x16xf32, #tpu.memory_space<vmem>>, vector<1x1x16x16xf32>,
    %69 = vector.extract_strided_slice %55 {offsets = [1, 0, 0], sizes = [1, 16, 16], strides = [1, 1, 1]} : vector<3x16x16xf32> to vector<1x16x16xf32>
    %70 = vector.shape_cast %69 : vector<1x16x16xf32> to vector<16x16xf32>
    %cst_26 = arith.constant 1.000000e+00 : f32
    %71 = vector.broadcast %cst_26 : f32 to vector<16x16xf32>
    %72 = arith.minimumf %70, %71 : vector<16x16xf32>
    %c0_27 = arith.constant 0 : index
    %c1 = arith.constant 1 : index
    %c0_28 = arith.constant 0 : index
    %c0_29 = arith.constant 0 : index
    %73 = vector.load %arg5[%c0_27, %c1, %c0_28, %c0_29] : memref<1x3x16x16xf32, #tpu.memory_space<vmem>>, vector<1x1x16x16xf32>
    %74 = vector.shape_cast %73 : vector<1x1x16x16xf32> to vector<16x16xf32>
    %75 = vector.shape_cast %72 : vector<16x16xf32> to vector<1x1x16x16xf32>
    tpu.vector_store %arg5[%c0_27, %c1, %c0_28, %c0_29], %75 {strides = array<i32>} : memref<1x3x16x16xf32, #tpu.memory_space<vmem>>, vector<1x1x16x16xf32>,
    %76 = vector.extract_strided_slice %55 {offsets = [2, 0, 0], sizes = [1, 16, 16], strides = [1, 1, 1]} : vector<3x16x16xf32> to vector<1x16x16xf32>
    %77 = vector.shape_cast %76 : vector<1x16x16xf32> to vector<16x16xf32>
    %78 = vector.broadcast %59 : f32 to vector<16x16xf32>
    %79 = arith.mulf %77, %78 : vector<16x16xf32>
    %cst_30 = arith.constant 1.000000e+00 : f32
    %80 = vector.broadcast %cst_30 : f32 to vector<16x16xf32>
    %81 = arith.minimumf %79, %80 : vector<16x16xf32>
    %c0_31 = arith.constant 0 : index
    %c2 = arith.constant 2 : index
    %c0_32 = arith.constant 0 : index
    %c0_33 = arith.constant 0 : index
    %82 = vector.load %arg5[%c0_31, %c2, %c0_32, %c0_33] : memref<1x3x16x16xf32, #tpu.memory_space<vmem>>, vector<1x1x16x16xf32>
    %83 = vector.shape_cast %82 : vector<1x1x16x16xf32> to vector<16x16xf32>
    %84 = vector.shape_cast %81 : vector<16x16xf32> to vector<1x1x16x16xf32>
    tpu.vector_store %arg5[%c0_31, %c2, %c0_32, %c0_33], %84 {strides = array<i32>} : memref<1x3x16x16xf32, #tpu.memory_space<vmem>>, vector<1x1x16x16xf32>,
    return
  }
  func.func @transform_0(%arg0: i32, %arg1: i32) -> i32 {
    %c0_i32 = arith.constant 0 : i32
    %c0_i32_0 = arith.constant 0 : i32
    return %c0_i32 : i32
  }
  func.func @transform_1(%arg0: i32, %arg1: i32) -> (i32, i32, i32, i32) {
    %c0_i32 = arith.constant 0 : i32
    %c0_i32_0 = arith.constant 0 : i32
    %c0_i32_1 = arith.constant 0 : i32
    return %arg0, %c0_i32, %arg1, %c0_i32_0 : i32, i32, i32, i32
  }
  func.func @transform_2(%arg0: i32, %arg1: i32) -> (i32, i32, i32, i32) {
    %c0_i32 = arith.constant 0 : i32
    %c0_i32_0 = arith.constant 0 : i32
    %c0_i32_1 = arith.constant 0 : i32
    return %arg0, %c0_i32, %arg1, %c0_i32_0 : i32, i32, i32, i32
  }
  func.func @transform_3(%arg0: i32, %arg1: i32) -> (i32, i32, i32, i32) {
    %c0_i32 = arith.constant 0 : i32
    %c0_i32_0 = arith.constant 0 : i32
    %c0_i32_1 = arith.constant 0 : i32
    return %arg0, %c0_i32, %arg1, %c0_i32_0 : i32, i32, i32, i32
  }
  func.func @transform_4(%arg0: i32, %arg1: i32) -> (i32, i32, i32, i32) {
    %c0_i32 = arith.constant 0 : i32
    %c0_i32_0 = arith.constant 0 : i32
    %c0_i32_1 = arith.constant 0 : i32
    return %arg0, %c0_i32, %arg1, %c0_i32_0 : i32, i32, i32, i32
  }
}

</mosaic_0001>

<bundles_post_ra>
// kernel: tpu_custom_call.1
= control target key start
LH: loop header
LB: loop body
LE: loop exit
PB: predicated region body
PF: predicated region fallthrough
CT: control target
= control target key end

     0   :  { %s1559_s0 = inlined_call_operand.hbm [shape: f32[10], index: 0, kind: input, shape index: {}]   ;;  %s1560_s1 = inlined_call_operand.hbm [shape: f32[2,3,16,16], index: 1, kind: input, shape index: {}]   ;;  %s1561_s2 = inlined_call_operand.hbm [shape: f32[2,1,16,16], index: 2, kind: input, shape index: {}]   ;;  %s1562_s3 = inlined_call_operand.hbm [shape: f32[2,3,16,16], index: 3, kind: output, shape index: {0}]   ;;  %s1563_s4 = inlined_call_operand.hbm [shape: f32[2,1,16,16], index: 4, kind: output, shape index: {1}]  }
   0x1   :  { %1568 = sst [smem:[#allocation20_spill]] %s1559_s0 }
   0x2   :  { %1569 = sst [smem:[#allocation21_spill]] %s1560_s1 }
   0x3   :  { %10 = vsyncpa [#allocation5], 0 }
   0x4   :  { %11 = vsyncpa [#allocation3], 0 }
   0x5   :  { %13 = vsyncpa [#allocation3 + $0x1], 0 }
   0x6   :  { %14 = vsyncpa [#allocation8], 0 }
   0x7   :  { %16 = vsyncpa [#allocation8 + $0x1], 0 }
   0x8   :  { %17 = vsyncpa [#allocation4], 0 }
   0x9   :  { %19 = vsyncpa [#allocation4 + $0x1], 0 }
   0xa   :  { %20 = vsyncpa [#allocation11], 0 }
   0xb   :  { %22 = vsyncpa [#allocation11 + $0x1], 0  ;;  %s1231_s15 = smov 0   ;;  %s1233_s16 = smov 0  }
   0xc   :  { %s1235_s17 = smov 0   ;;  %s1237_s18 = smov 0  }
   0xd   :  { %s1239_s19 = smov 0   ;;  %s1241_s20 = smov 0  }
   0xe LB: > { %1570 = sst [smem:[#allocation17_spill]] %s1194_s20  ;;  %s818_s21 = sadd.s32 4294967295, %s1194_s20   ;;  %s1194_s20 = sphi %s1241_s20, %s1593_s20   ;;  %s1190_s19 = sphi %s1239_s19, %s1592_s19   ;;  %s1186_s18 = sphi %s1237_s18, %s1591_s18   ;;  %s1182_s17 = sphi %s1235_s17, %s1590_s17   ;;  %s1178_s16 = sphi %s1233_s16, %s1589_s16   ;;  %s1174_s15 = sphi %s1231_s15, %s1588_s15  }
   0xf   : > { %s819_s22 = sadd.s32 4294967294, %s1194_s20   ;;  %s70_s23 = sadd.s32 1, %s1182_s17 }
  0x10   : > { %p77_p0 = scmp.ne.s32.totalorder %s1182_s17, %s1178_s16  ;;  %p78_p1 = scmp.eq.s32.totalorder %s1194_s20, 0 }
  0x11   : > { %p83_p2 = scmp.ne.s32.totalorder %s1178_s16, %s1174_s15  ;;  %p1269_p3 = scmp.eq.s32.totalorder %s818_s21, 0 }
  0x12   : > { %p137_p4 = scmp.eq.s32.totalorder %s818_s21, 1  ;;  %p79_p5 = por %p78_p1, %p77_p0 }
  0x13   : > { %p143_p6 = scmp.eq.s32.totalorder %s819_s22, 1  ;;  %p1275_p7 = por %p1269_p3, %p83_p2 }
  0x14   : > { %p1279_p8 = por %p137_p4, %p77_p0  ;;  %p820_p10 = scmp.ge.s32.totalorder %s1194_s20, 1 }
  0x15   : > { %p1283_p9 = por %p143_p6, %p83_p2  ;;  %p178_p11 = scmp.lt.s32.totalorder %s1194_s20, 3 }
  0x16   : > { %p928_p1 = scmp.lt.s32.totalorder %s1194_s20, 2  ;;  %s1296_s29 = sand.u32 1, %s1182_s17  }
  0x17   : > { %s1574_s27 = scalar_select %p1283_p9, 1, 0 }
  0x18   : > { %p1290_p13 = pnand %p820_p10, %p178_p11  ;;  %p1300_p2 = pnand %p928_p1, %p79_p5 }
  0x19   : > { %1575 = sst [smem:[#allocation18_spill]] %s1574_s27  ;;  %s40_s5 = sadd.s32 1, %s1190_s19 }
  0x1a   : > { %p909_p0 = pneg %p1290_p13  ;;  %s893_s6 = smul.u32 48, %s1296_s29 }
  0x1b   : > { %p42_p6 = scmp.ge.s32.totalorder %s40_s5, 2  ;;  %s1196_s7 = smov [#allocation2]  }
  0x1c   : > { %p910_p4 = pnand %p909_p0, %p1269_p3  ;;  %s1578_s0 = sld [smem:[#allocation20_spill]] }
  0x1d   : > { %s1595_s5 = smov (%p42_p6, %s40_s5), 0  ;;  %s894_s10 = smul.u32 768, %s1190_s19 }
  0x1e   : > { %1579 = sst [smem:[#allocation19_spill]] %s1595_s5  ;;  %s65_s11 = ssub.s32 %s1190_s19, %s1595_s5 }
  0x1f   : > { %s204_s12 = scalar_lea.vmem [#allocation6], %s893_s6  ;;  %p68_p5 = scmp.eq.s32.totalorder %s65_s11, 0 }
  0x20   : > { %s213_s13 = sshll.u32 %s204_s12, 4  ;;  %s1580_s1 = sld [smem:[#allocation21_spill]]  ;;  %s214_s13 = int_to_ptr.vmem [resolvable:$true] %s213_s13 }
  0x21   : > { %s1322_s20 = scalar_select %p68_p5, %s1182_s17, %s70_s23  }
  0x22   : > { %912 = dma.hbm_to_smem (!%p910_p4), %s1578_s0, 16, %s1196_s7, [#allocation5]  }
  0x23   : > { %s201_s27 = scalar_lea.sflag [#allocation3], %s1296_s29  ;;  %p1022_p10 = pneg %p1300_p2 }
  0x24   : > { %s1033_s7 = scalar_lea.vmem %s214_s13, 768  ;;  %s1197_s6 = smov [#allocation6]  }
  0x25   : > { %p1034_p11 = scmp.ne.s32.totalorder %s214_s13, %s1033_s7  ;;  %s1038_s8 = sshll.u32 %s1197_s6, 4  ;;  %s1039_s8 = int_to_ptr.vmem [resolvable:$false] %s1038_s8 }
  0x26   : > { %s212_s22 = scalar_lea.hbm %s1580_s1, %s894_s10  ;;  %s1040_s9 = scalar_lea.vmem %s1039_s8, 1536 }
  0x27   : > { %p1036_p1 = pnand %p1034_p11, %p1022_p10  ;;  %p1041_p4 = scmp.lt.s32.totalorder %s214_s13, %s1039_s8 }
  0x28   : > { %p1042_p6 = scmp.lt.s32.totalorder %s1040_s9, %s1033_s7 }
  0x29   : > { %p1037_p0 = pneg %p1036_p1 }
  0x2a   : > { %p1043_p12 = por %p1042_p6, %p1041_p4 }
  0x2c   : > { %p1044_p9 = pnand %p1043_p12, %p1037_p0 }
  0x2e   : > { %1047 = shalt.err (!%p1044_p9)
}
  0x2f   : > { %s1198_s23 = smov 128   ;;  %s1199_s10 = smov 8  }
  0x30   : > { %916 = dma.hbm_to_vmem [thread:$0]  (!%p1300_p2), %s212_s22, 768, %s214_s13, %s201_s27, %s1198_s23, %s1198_s23, %s1199_s10  }
  0x31   : > { %s824_s11 = sshll.u32 %s1296_s29, 4  ;;  %s855_s12 = sshll.u32 %s1190_s19, 8 }
  0x32   : > { %s235_s6 = scalar_lea.hbm %s1561_s2, %s855_s12  ;;  %s227_s8 = scalar_lea.vmem [#allocation7], %s824_s11 }
  0x33   : > { %s236_s7 = sshll.u32 %s227_s8, 4  ;;  %s224_s9 = scalar_lea.sflag [#allocation8], %s1296_s29  ;;  %s237_s7 = int_to_ptr.vmem [resolvable:$true] %s236_s7 }
  0x34   : > { %s1061_s0 = scalar_lea.vmem %s237_s7, 256  ;;  %s1200_s1 = smov [#allocation7]  }
  0x35   : > { %p1062_p9 = scmp.ne.s32.totalorder %s237_s7, %s1061_s0  ;;  %s1066_s5 = sshll.u32 %s1200_s1, 4  ;;  %s1067_s5 = int_to_ptr.vmem [resolvable:$false] %s1066_s5 }
  0x36   : > { %s1068_s27 = scalar_lea.vmem %s1067_s5, 512  ;;  %p1069_p11 = scmp.lt.s32.totalorder %s237_s7, %s1067_s5 }
  0x37   : > { %p1064_p12 = pnand %p1062_p9, %p1022_p10  ;;  %p1070_p1 = scmp.lt.s32.totalorder %s1068_s27, %s1061_s0 }
  0x39   : > { %p1065_p5 = pneg %p1064_p12  ;;  %p1071_p0 = por %p1070_p1, %p1069_p11 }
  0x3b   : > { %p1072_p4 = pnand %p1071_p0, %p1065_p5 }
  0x3d   : > { %1075 = shalt.err (!%p1072_p4)
}
  0x3e   : > { %919 = dma.hbm_to_vmem [thread:$0]  (!%p1300_p2), %s235_s6, 256, %s237_s7, %s224_s9, %s1198_s23, %s1198_s23, %s1199_s10  }
  0x3f   : > { %248 = sbr.rel (%p1290_p13) target bundleno = 348 (0x15c), region = 32 }
  0x44   : > { %1153 = dma.done.wait (%p1269_p3), [#allocation5], 16  }
  0x45   : > { %1155 = vsyncadd (%p1269_p3), [#allocation5], 4294967280  ;;  %s1350_s1 = sand.u32 1, %s1178_s16  }
  0x46   : > { %s895_s0 = smul.u32 48, %s1350_s1  ;;  %s255_s29 = scalar_lea.sflag [#allocation3], %s1350_s1 }
  0x48   : > { %s1356_s30 = scalar_lea.vmem [#allocation6], %s895_s0 }
  0x49   : > { %1157 = dma.done.wait (%p1275_p7), %s255_s29, 768  }
  0x4a   : > { %1159 = vsyncadd (%p1275_p7), %s255_s29, 4294966528  ;;  %s829_s24 = sshll.u32 %s1350_s1, 4  ;;  %s264_s28 = scalar_lea.sflag [#allocation8], %s1350_s1 }
  0x4b   : > { %s1366_s5 = scalar_lea.vmem [#allocation7], %s829_s24 }
  0x4c   : > { %1161 = dma.done.wait (%p1275_p7), %s264_s28, 256  }
  0x4d   : > { %1163 = vsyncadd (%p1275_p7), %s264_s28, 4294967040 }
  0x4e   : > { %272 = sfence }
  0x4f   : > { %v324_v0 = vlaneseq  ;;  %v318_v1 = vld [vmem:[%s1356_s30] sm:$0xff]  ;;  %vm337_vm0 = vcmask 130048   ;;  %v1201_v8 = vmov 1.0   ;;  %v319_v9 = vld [vmem:[%s1356_s30 + $0x8] sm:$0xff]  ;;  %v320_v11 = vld [vmem:[%s1356_s30 + $0x10] sm:$0xff]  ;;  %s1401_s25 = smul.u32 5, %s1186_s18 }
  0x50   : > { %v322_v2 = vld [vmem:[%s1356_s30 + $0x20] sm:$0xff]  ;;  %873 = vmatprep.mubr.msk.f32.mxu0 %vm337_vm0, %v318_v1  ;;  %v323_v10 = vld [vmem:[%s1356_s30 + $0x28] sm:$0xff]  ;;  %v321_v13 = vld [vmem:[%s1356_s30 + $0x18] sm:$0xff]  ;;  %s302_s23 = scalar_lea.vmem [#allocation10], %s829_s24  ;;  %s856_s11 = sshll.u32 %s1186_s18, 8 }
  0x51   : > { %879 = vmatprep.mubr.msk.f32.mxu1 %vm337_vm0, %v322_v2  ;;  %v325_v3 = vshrl.u32 %v324_v0, 7  ;;  %v328_v4 = vand.u32 127, %v324_v0  ;;  %v460_v12 = vld [vmem:[%s1366_s5] sm:$0xff]  ;;  %v461_v14 = vld [vmem:[%s1366_s5 + $0x8] sm:$0xff]  ;;  %s308_s13 = sld [smem:[#allocation2 + %s1401_s25]]  ;;  %s658_s10 = sshll.u32 %s302_s23, 4  ;;  %s1436_s10 = int_to_ptr.vmem [resolvable:$true] %s658_s10 }
  0x52   : > { %s309_s12 = sadd.s32 1, %s1401_s25  ;;  %s1449_s6 = scalar_lea.hbm %s1563_s4, %s856_s11 }
  0x53   : > { %v326_v5 = vadd.s32 8, %v325_v3  ;;  %v329_v6 = vadd.s32 %v328_v4, %v325_v3  ;;  %s1454_s8 = sld [smem:[#allocation2 + %s309_s12]]  ;;  %s625_s7 = scalar_lea.sflag [#allocation11], %s1350_s1 }
  0x54   : > { %s1076_s9 = scalar_lea.vmem %s1436_s10, 256  ;;  %s1202_s27 = smov [#allocation10]  }
  0x55   : > { %v330_v7 = vadd.s32 %v328_v4, %v326_v5  ;;  %vm331_vm2 = vcmp.eq.s32.totalorder %v329_v6, 15  ;;  %p1077_p7 = scmp.ne.s32.totalorder %s1436_s10, %s1076_s9  ;;  %s1080_s29 = sshll.u32 %s1202_s27, 4  ;;  %s1081_s29 = int_to_ptr.vmem [resolvable:$false] %s1080_s29 }
  0x56   : > { %s1082_s30 = scalar_lea.vmem %s1081_s29, 512  ;;  %p1083_p10 = scmp.lt.s32.totalorder %s1436_s10, %s1081_s29 }
  0x57   : > { %vm332_vm1 = vcmp.eq.s32.totalorder %v330_v7, 15  ;;  %p317_p3 = scmp.gt.f32.partialorder %s308_s13, 0.5  ;;  %p1078_p13 = pnand %p1077_p7, %p1279_p8 }
  0x58   : > { %869 = vmatprep.subr.msk.mxu0 %vm332_vm1, %v1201_v8  ;;  %889 = vmatprep.subr.msk.mxu1 %vm332_vm1, %v1201_v8  ;;  %p1084_p6 = scmp.lt.s32.totalorder %s1082_s30, %s1076_s9 }
  0x59   : > { %870 = vmatpush3.msk.msra.mxu0 %vm332_vm1, %v1201_v8  ;;  %891 = vmatpush3.msk.msra.mxu1 %vm332_vm1, %v1201_v8  ;;  %s451_s22 = scalar_select %p317_p3, 1, 0 }
  0x5a   : > { %871 = vmatprep.subr.msk.mxu0 %vm331_vm2, %v1201_v8  ;;  %890 = vmatprep.subr.msk.mxu1 %vm331_vm2, %v1201_v8  ;;  %p1079_p2 = pneg %p1078_p13  ;;  %p1085_p9 = por %p1084_p6, %p1083_p10 }
  0x5b   : > { %872 = vmatpush3.msk.msra.mxu0 %vm331_vm2, %v1201_v8  ;;  %892 = vmatpush3.msk.msra.mxu1 %vm331_vm2, %v1201_v8  ;;  %v452_v15 = vstv %s451_s22 }
  0x5c   : > { %874 = vmatmul.mubr.msk.f32.vlgmr.msra.gmra.mxu0 %vm337_vm0, %v319_v9  ;;  %880 = vmatmul.mubr.msk.f32.vlgmr.msra.gmra.mxu1 %vm337_vm0, %v323_v10  ;;  %vm1404_vm3 = vcmp.eq.s32.totalorder %v452_v15, 1  ;;  %p1086_p12 = pnand %p1085_p9, %p1079_p2 }
  0x5d   : > { %876 = vmatprep.mubr.msk.f32.mxu0 %vm337_vm0, %v320_v11  ;;  %882 = vmatprep.subr.msk.mxu1 %vm332_vm1, %v1201_v8 }
  0x5e   : > { %883 = vmatpush3.msk.msra.mxu1 %vm332_vm1, %v1201_v8  ;;  %886 = vmatprep.mubr.msk.f32.mxu1 %vm337_vm0, %v460_v12 }
  0x5f   : > { %884 = vmatprep.subr.msk.mxu1 %vm331_vm2, %v1201_v8 }
  0x60   : > { %877 = vmatmul.mubr.msk.f32.gmra.mxu0 %vm337_vm0, %v321_v13  ;;  %885 = vmatpush3.msk.msra.mxu1 %vm331_vm2, %v1201_v8 }
  0x61   : > { %887 = vmatmul.mubr.msk.f32.vlgmr.msra.gmra.mxu1 %vm337_vm0, %v461_v14 }
 0x11c   : > { %v875_v17 = vpop.f32.mrf.mxu0  ;;  %v881_v18 = vpop.f32.mrf.mxu1 }
 0x11d   : > { %v1410_v19 = vsel %vm1404_vm3, %v875_v17, %v319_v9  ;;  %v1414_v20 = vsel %vm1404_vm3, %v881_v18, %v323_v10 }
 0x11e   : > { %v548_v21 = vmax.f32 %v1410_v19, 1e-12  ;;  %v552_v22 = vmax.f32 %v1414_v20, 1e-12  ;;  %v422_v23 = vpop.f32.mrf.mxu0  ;;  %v442_v24 = vpop.f32.mrf.mxu1 }
 0x11f   : > { %v1422_v25 = vsel %vm1404_vm3, %v422_v23, %v318_v1  ;;  %v1426_v26 = vsel %vm1404_vm3, %v442_v24, %v322_v2 }
 0x120   : > { %985 = vlog2.f32 %v548_v21  ;;  %v547_v27 = vmax.f32 %v1422_v25, 1e-12  ;;  %v551_v28 = vmax.f32 %v1426_v26, 1e-12  ;;  %v878_v29 = vpop.f32.mrf.mxu0 }
 0x121   : > { %987 = vlog2.f32 %v552_v22  ;;  %v1434_v30 = vsel %vm1404_vm3, %v878_v29, %v321_v13  ;;  %v888_v31 = vpop.f32.mrf.mxu1 }
 0x122   : > { %989 = vlog2.f32 %v547_v27  ;;  %v550_v32 = vmax.f32 %v1434_v30, 1e-12  ;;  %v432_v33 = vpop.f32.mrf.mxu0  ;;  %v544_v34 = vsel %vm1404_vm3, %v888_v31, %v461_v14 }
 0x123   : > { %991 = vlog2.f32 %v551_v28  ;;  %v1443_v35 = vsel %vm1404_vm3, %v432_v33, %v320_v11  ;;  %546 = vst.msk [vmem:[%s302_s23 + $0x8] sm:$0xff] %vm337_vm0, %v544_v34  ;;  %v534_v36 = vpop.f32.mrf.mxu1 }
 0x124   : > { %993 = vlog2.f32 %v550_v32  ;;  %v549_v37 = vmax.f32 %v1443_v35, 1e-12  ;;  %v543_v38 = vsel %vm1404_vm3, %v534_v36, %v460_v12 }
 0x125   : > { %545 = vst.msk [vmem:[%s302_s23] sm:$0xff] %vm337_vm0, %v543_v38 }
 0x126   : > { %995 = vlog2.f32 %v549_v37 }
 0x127   : > { %1089 = shalt.err (!%p1086_p12)
}
 0x128   : > { %s1090_s24 = scalar_lea.hbm %s1449_s6, 256  ;;  %s1094_s13 = scalar_lea.hbm %s1563_s4, 512 }
 0x129   : > { %p1091_p5 = scmp.ne.s32.totalorder %s1449_s6, %s1090_s24  ;;  %p1095_p0 = scmp.lt.s32.totalorder %s1449_s6, %s1563_s4 }
 0x12a   : > { %p1096_p4 = scmp.lt.s32.totalorder %s1094_s13, %s1090_s24 }
 0x12b   : > { %p1092_p11 = pnand %p1091_p5, %p1279_p8 }
 0x12c   : > { %p1097_p3 = por %p1096_p4, %p1095_p0 }
 0x12d   : > { %p1093_p1 = pneg %p1092_p11 }
 0x12f   : > { %p1098_p7 = pnand %p1097_p3, %p1093_p1 }
 0x131   : > { %1101 = shalt.err (!%p1098_p7)
}
 0x132   : > { %s1203_s11 = smov 128   ;;  %s1204_s12 = smov 8   ;;  %v986_v39 = vpop.eup %985  ;;  %v571_v40 = vstv %s1454_s8  ;;  %vm554_vm4 = vcmp.gt.f32.partialorder %v1410_v19, 0.0  ;;  %vm558_vm5 = vcmp.gt.f32.partialorder %v1414_v20, 0.0  ;;  %vm553_vm6 = vcmp.gt.f32.partialorder %v1422_v25, 0.0 }
 0x133   : > { %906 = dma.vmem_to_hbm [thread:$0]  (%p1279_p8), %s1436_s10, 256, %s1449_s6, %s625_s7, %s1203_s11, %s1203_s11, %s1204_s12   ;;  %v988_v41 = vpop.eup %987  ;;  %v562_v42 = vmul.f32 0.6931472, %v986_v39  ;;  %vm557_vm7 = vcmp.gt.f32.partialorder %v1426_v26, 0.0  ;;  %vm556_vm8 = vcmp.gt.f32.partialorder %v1434_v30, 0.0  ;;  %vm555_vm9 = vcmp.gt.f32.partialorder %v1443_v35, 0.0 }
 0x134   : > { %s315_s14 = sadd.s32 4, %s1401_s25  ;;  %v990_v43 = vpop.eup %989  ;;  %v570_v44 = vmul.f32 0.6931472, %v988_v41  ;;  %s311_s9 = sadd.s32 2, %s1401_s25 }
 0x135   : > { %v992_v45 = vpop.eup %991  ;;  %s1485_s21 = sld [smem:[#allocation2 + %s315_s14]]  ;;  %v573_v46 = vmul.f32 %v571_v40, %v562_v42  ;;  %v560_v47 = vmul.f32 0.6931472, %v990_v43  ;;  %s313_s27 = sadd.s32 3, %s1401_s25 }
 0x136   : > { %v994_v48 = vpop.eup %993  ;;  %v577_v49 = vmul.f32 %v571_v40, %v570_v44  ;;  %v568_v50 = vmul.f32 0.6931472, %v992_v45  ;;  %s312_s10 = sld [smem:[#allocation2 + %s311_s9]]  ;;  %s896_s25 = smul.u32 768, %s1186_s18 }
 0x137   : > { %v580_v51 = vmul.f32 1.442695, %v573_v46  ;;  %v572_v52 = vmul.f32 %v571_v40, %v560_v47  ;;  %v566_v53 = vmul.f32 0.6931472, %v994_v48  ;;  %v996_v54 = vpop.eup %995  ;;  %s314_s6 = sld [smem:[#allocation2 + %s313_s27]]  ;;  %s295_s8 = scalar_lea.vmem [#allocation9], %s895_s0 }
 0x138   : > { %v588_v55 = vmul.f32 1.442695, %v577_v49  ;;  %v576_v56 = vmul.f32 %v571_v40, %v568_v50  ;;  %v564_v59 = vmul.f32 0.6931472, %v996_v54  ;;  %s640_s7 = sshll.u32 %s295_s8, 4  ;;  %s1506_s29 = scalar_lea.hbm %s1562_s3, %s896_s25  ;;  %s1508_s7 = int_to_ptr.vmem [resolvable:$true] %s640_s7 }
 0x139   : > { %997 = vpow2.f32 %v580_v51  ;;  %v578_v57 = vmul.f32 1.442695, %v572_v52  ;;  %v575_v58 = vmul.f32 %v571_v40, %v566_v53  ;;  %s620_s30 = scalar_lea.sflag [#allocation4], %s1350_s1  ;;  %s1102_s24 = scalar_lea.vmem %s1508_s7, 768 }
 0x13a   : > { %999 = vpow2.f32 %v588_v55  ;;  %v586_v60 = vmul.f32 1.442695, %v576_v56  ;;  %v574_v62 = vmul.f32 %v571_v40, %v564_v59  ;;  %p1103_p2 = scmp.ne.s32.totalorder %s1508_s7, %s1102_s24  ;;  %s1205_s28 = smov [#allocation9]  }
 0x13b   : > { %1001 = vpow2.f32 %v578_v57  ;;  %v584_v61 = vmul.f32 1.442695, %v575_v58  ;;  %p596_p13 = scmp.gt.f32.partialorder %s1485_s21, 0.5  ;;  %s1106_s5 = sshll.u32 %s1205_s28, 4  ;;  %s1107_s5 = int_to_ptr.vmem [resolvable:$false] %s1106_s5 }
 0x13c   : > { %1003 = vpow2.f32 %v586_v60  ;;  %v582_v63 = vmul.f32 1.442695, %v574_v62  ;;  %p1104_p10 = pnand %p1103_p2, %p1279_p8  ;;  %s1108_s13 = scalar_lea.vmem %s1107_s5, 1536 }
 0x13d   : > { %1005 = vpow2.f32 %v584_v61  ;;  %s1597_s10 = smov (!%p596_p13, %s312_s10), 1.0  ;;  %s1599_s6 = smov (!%p596_p13, %s314_s6), 1.0 }
 0x13e   : > { %1007 = vpow2.f32 %v582_v63  ;;  %v599_v0 = vstv %s1597_s10  ;;  %v611_v2 = vstv %s1599_s6  ;;  %p1105_p6 = pneg %p1104_p10  ;;  %p1109_p9 = scmp.lt.s32.totalorder %s1508_s7, %s1107_s5 }
 0x13f   : > { %p1110_p12 = scmp.lt.s32.totalorder %s1108_s13, %s1102_s24 }
 0x141   : > { %p1111_p5 = por %p1110_p12, %p1109_p9 }
 0x143   : > { %p1112_p11 = pnand %p1111_p5, %p1105_p6 }
 0x146   : > { %v998_v1 = vpop.eup %997 }
 0x147   : > { %v1000_v3 = vpop.eup %999  ;;  %v591_v4 = vsel %vm554_vm4, %v998_v1, 0.0 }
 0x148   : > { %v1002_v5 = vpop.eup %1001  ;;  %v601_v6 = vmul.f32 %v599_v0, %v591_v4  ;;  %v595_v7 = vsel %vm558_vm5, %v1000_v3, 0.0 }
 0x149   : > { %v1004_v8 = vpop.eup %1003  ;;  %v613_v9 = vmul.f32 %v611_v2, %v595_v7  ;;  %v590_v10 = vsel %vm553_vm6, %v1002_v5, 0.0 }
 0x14a   : > { %v1006_v11 = vpop.eup %1005  ;;  %v603_v12 = vmin.f32 %v601_v6, 1.0  ;;  %v600_v13 = vmul.f32 %v599_v0, %v590_v10  ;;  %v594_v14 = vsel %vm557_vm7, %v1004_v8, 0.0 }
 0x14b   : > { %v615_v15 = vmin.f32 %v613_v9, 1.0  ;;  %v612_v16 = vmul.f32 %v611_v2, %v594_v14  ;;  %v593_v17 = vsel %vm556_vm8, %v1006_v11, 0.0  ;;  %v1008_v18 = vpop.eup %1007 }
 0x14c   : > { %605 = vst.msk [vmem:[%s295_s8 + $0x8] sm:$0xff] %vm337_vm0, %v603_v12  ;;  %v602_v19 = vmin.f32 %v600_v13, 1.0  ;;  %v607_v20 = vmin.f32 %v593_v17, 1.0  ;;  %v592_v22 = vsel %vm555_vm9, %v1008_v18, 0.0 }
 0x14d   : > { %848 = vst.msk [vmem:[%s295_s8 + $0x28] sm:$0xff] %vm337_vm0, %v615_v15  ;;  %v614_v21 = vmin.f32 %v612_v16, 1.0  ;;  %v606_v23 = vmin.f32 %v592_v22, 1.0 }
 0x14e   : > { %604 = vst.msk [vmem:[%s295_s8] sm:$0xff] %vm337_vm0, %v602_v19  ;;  %846 = vst.msk [vmem:[%s295_s8 + $0x18] sm:$0xff] %vm337_vm0, %v607_v20 }
 0x14f   : > { %847 = vst.msk [vmem:[%s295_s8 + $0x20] sm:$0xff] %vm337_vm0, %v614_v21  ;;  %845 = vst.msk [vmem:[%s295_s8 + $0x10] sm:$0xff] %vm337_vm0, %v606_v23 }
 0x150   : > { %1115 = shalt.err (!%p1112_p11)
}
 0x151   : > { %s1116_s22 = scalar_lea.hbm %s1506_s29, 768  ;;  %s1120_s14 = scalar_lea.hbm %s1562_s3, 1536 }
 0x152   : > { %p1117_p1 = scmp.ne.s32.totalorder %s1506_s29, %s1116_s22  ;;  %p1121_p3 = scmp.lt.s32.totalorder %s1506_s29, %s1562_s3 }
 0x153   : > { %p1122_p7 = scmp.lt.s32.totalorder %s1120_s14, %s1116_s22 }
 0x154   : > { %p1118_p0 = pnand %p1117_p1, %p1279_p8 }
 0x155   : > { %p1123_p13 = por %p1122_p7, %p1121_p3 }
 0x156   : > { %p1119_p4 = pneg %p1118_p0 }
 0x158   : > { %p1124_p2 = pnand %p1123_p13, %p1119_p4 }
 0x15a   : > { %1127 = shalt.err (!%p1124_p2)
}
 0x15b   : > { %905 = dma.vmem_to_hbm [thread:$0]  (%p1279_p8), %s1508_s7, 768, %s1506_s29, %s620_s30, %s1203_s11, %s1203_s11, %s1204_s12  }
 0x15c PF: > { %s1583_s27 = sld [smem:[#allocation18_spill]]  ;;  %s673_s6 = sand.u32 1, %s1174_s15  }
 0x15d   : > { %s1584_s10 = sld [smem:[#allocation17_spill]]  ;;  %s674_s25 = scalar_lea.sflag [#allocation4], %s673_s6 }
 0x162   : > { %p1585_p10 = scmp.ne.s32.totalorder %s1583_s27, 0 }
 0x163   : > { %p1586_p6 = scmp.ge.s32.totalorder %s1584_s10, 2 }
 0x165   : > { %p921_p9 = pnand %p1586_p6, %p1585_p10 }
 0x167   : > { %p922_p12 = pneg %p921_p9 }
 0x169   : > { %1165 = dma.done.wait (%p922_p12), %s674_s25, 768  }
 0x16a   : > { %1167 = vsyncadd (%p922_p12), %s674_s25, 4294966528  ;;  %s683_s8 = scalar_lea.sflag [#allocation11], %s673_s6 }
 0x16b   : > { %1169 = dma.done.wait (%p922_p12), %s683_s8, 256  }
 0x16c   : > { %1171 = vsyncadd (%p922_p12), %s683_s8, 4294967040  ;;  %s28_s26 = sadd.s32 1, %s1584_s10   ;;  %s1587_s11 = sld [smem:[#allocation19_spill]] }
 0x16d   : > { %p25_p5 = scmp.ge.s32.totalorder %s28_s26, 4   ;;  %s1588_s15 = smov %s1178_s16 }
 0x16e   : > { %s1589_s16 = smov %s1182_s17  ;;  %s1590_s17 = smov %s1322_s20 }
 0x16f   : > { %s1591_s18 = smov %s1190_s19  ;;  %s1593_s20 = smov %s28_s26 }
 0x170   :  { %27 = sbr.rel (!%p25_p5) target bundleno = 14 (0xe), region = 114 }
 0x172   : > { %s1592_s19 = smov %s1587_s11 }
 0x175   :  { %688 = vsyncpa [#allocation3], 1 }
 0x176   :  { %690 = vsyncpa [#allocation3 + $0x1], 1 }
 0x177   :  { %691 = vsyncpa [#allocation8], 1 }
 0x178   :  { %693 = vsyncpa [#allocation8 + $0x1], 1 }
 0x179   :  { %694 = vsyncpa [#allocation4], 1 }
 0x17a   :  { %696 = vsyncpa [#allocation4 + $0x1], 1 }
 0x17b   :  { %697 = vsyncpa [#allocation11], 1 }
 0x17c   :  { %699 = vsyncpa [#allocation11 + $0x1], 1 }
 0x17d   :  { %700 = vsyncpa [#allocation5], 1 }
 0x17e   :  { %702 = vsyncpa [#allocation5 + $0x1], 1 }

</bundles_post_ra>
